<compile_context>
chip_gen: v6e
topology: v6e:2x2x1
jax: 0.10.0
libtpu: 0.0.40
codegen_flags: <defaults>
</compile_context>

<pallas_src>
import jax
import jax.numpy as jnp
from jax.experimental import pallas as pl
from jax.experimental.pallas import tpu as pltpu


def critic_kernel(x_ref, w1_ref, b1_ref, w2_ref, b2_ref, w3_ref, b3_ref, o_ref):
    x = x_ref[...]                                                 # (TB, n_states)
    # fc: (TB, n_states) @ (n_states, H) + (1, H), MXU with f32 accumulation.
    h = jnp.dot(x, w1_ref[...], preferred_element_type=jnp.float32)
    h = jnp.tanh(h + b1_ref[...])                                  # EUP
    # fc2: (TB, H) @ (H, H) + (1, H)
    h = jnp.dot(h, w2_ref[...], preferred_element_type=jnp.float32)
    h = jnp.tanh(h + b2_ref[...])
    # fc3 (out_features = 1): VPU multiply + XLU lane reduction, skip the MXU.
    out = jnp.sum(h * w3_ref[...], axis=-1, keepdims=True) + b3_ref[0, 0]
    o_ref[...] = out.astype(o_ref.dtype)                           # (TB, 1)


def critic_forward(x, params, *, max_tile=512):
    """x: (B, n_states) float32. params: dict with (in, out)-layout weights."""
    w1, b1 = params["w1"], params["b1"]
    w2, b2 = params["w2"], params["b2"]
    w3_row = params["w3"].reshape(1, -1)          # (1, H) lane-dense row for VPU path
    b3 = params["b3"].reshape(1, 1)               # scalar -> SMEM

    B, n_states = x.shape

    # Batch tile: multiple of 8 sublanes, capped so large batches pipeline.
    tb = min(max_tile, ((B + 7) // 8) * 8)
    tb = max(tb, 8)
    b_pad = pl.cdiv(B, tb) * tb
    if b_pad != B:
        x = jnp.pad(x, ((0, b_pad - B), (0, 0)))

    # Resident operands: constant block index across the batch grid -> no re-DMA.
    def resident(a):
        return pl.BlockSpec(a.shape, lambda i: (0,) * a.ndim)

    out = pl.pallas_call(
        critic_kernel,
        out_shape=jax.ShapeDtypeStruct((b_pad, 1), jnp.float32),
        grid=(b_pad // tb,),
        in_specs=[
            pl.BlockSpec((tb, n_states), lambda i: (i, 0)),        # x walks the batch
            resident(w1), resident(b1),
            resident(w2), resident(b2),
            resident(w3_row),
            pl.BlockSpec(memory_space=pltpu.MemorySpace.SMEM),     # b3 scalar
        ],
        out_specs=pl.BlockSpec((tb, 1), lambda i: (i, 0)),
        compiler_params=pltpu.CompilerParams(
            dimension_semantics=("parallel",)),                    # v7x: 2 TCs
    )(x, w1, b1, w2, b2, w3_row, b3)
    return out[:B]


def init_critic_params(key, n_states, hidden_dim):
    """Deterministic init mimicking PyTorch nn.Linear (U[-1/sqrt(fan_in), +1/sqrt(fan_in)])."""
    ks = jax.random.split(key, 6)

    def linear(kw, kb, fan_in, fan_out):
        bound = 1.0 / jnp.sqrt(jnp.float32(fan_in))
        w = jax.random.uniform(kw, (fan_in, fan_out), jnp.float32, -bound, bound)
        b = jax.random.uniform(kb, (1, fan_out), jnp.float32, -bound, bound)
        return w, b

    w1, b1 = linear(ks[0], ks[1], n_states, hidden_dim)
    w2, b2 = linear(ks[2], ks[3], hidden_dim, hidden_dim)
    w3, b3 = linear(ks[4], ks[5], hidden_dim, 1)
    return {"w1": w1, "b1": b1, "w2": w2, "b2": b2, "w3": w3, "b3": b3}


def critic_ref(x, p):
    """Pure-JAX reference for correctness check."""
    h = jnp.tanh(x @ p["w1"] + p["b1"])
    h = jnp.tanh(h @ p["w2"] + p["b2"])
    return h @ p["w3"] + p["b3"]


if __name__ == "__main__":
    key = jax.random.PRNGKey(0)
    k_x, k_x2, k_p = jax.random.split(key, 3)

    batch, n_states, hidden_dim = 8, 4, 32
    x = jax.random.normal(k_x, (batch, n_states), dtype=jnp.float32)
    params = init_critic_params(k_p, n_states, hidden_dim)

    # Single-tile case (grid = 1).
    out = jax.block_until_ready(critic_forward(x, params))
    ref = critic_ref(x, params)
    assert out.shape == (batch, 1)
    assert jnp.allclose(out, ref, atol=1e-5, rtol=1e-5)

    # Multi-tile case: forces the batch grid (padding + VMEM-resident weights).
    batch2 = 20
    x2 = jax.random.normal(k_x2, (batch2, n_states), dtype=jnp.float32)
    out2 = jax.block_until_ready(critic_forward(x2, params, max_tile=8))
    ref2 = critic_ref(x2, params)
    assert out2.shape == (batch2, 1)
    assert jnp.allclose(out2, ref2, atol=1e-5, rtol=1e-5)

    print("KERNEL_OK")
</pallas_src>

<mosaic_0001>
module attributes {stable_mosaic.version = 11 : i64} {
  func.func @critic_kernel(%arg0: i32, %arg1: memref<8x4xf32, #tpu.memory_space<vmem>>, %arg2: memref<4x32xf32, #tpu.memory_space<vmem>>, %arg3: memref<1x32xf32, #tpu.memory_space<vmem>>, %arg4: memref<32x32xf32, #tpu.memory_space<vmem>>, %arg5: memref<1x32xf32, #tpu.memory_space<vmem>>, %arg6: memref<1x32xf32, #tpu.memory_space<vmem>>, %arg7: memref<1x1xf32, #tpu.memory_space<smem>>, %arg8: memref<8x1xf32, #tpu.memory_space<vmem>>) attributes {dimension_semantics = [#tpu.dimension_semantics<parallel>], iteration_bounds = array<i64: 1>, scalar_prefetch = 0 : i64, scratch_operands = 0 : i64, tpu.core_type = #tpu.core_type<tc>, window_params = [{transform_indices = @transform_0, window_bounds = array<i64: 8, 4>}, {pipeline_mode = #tpu.pipeline_mode<synchronous>, transform_indices = @transform_1, window_bounds = array<i64: 4, 32>}, {pipeline_mode = #tpu.pipeline_mode<synchronous>, transform_indices = @transform_2, window_bounds = array<i64: 1, 32>}, {pipeline_mode = #tpu.pipeline_mode<synchronous>, transform_indices = @transform_3, window_bounds = array<i64: 32, 32>}, {pipeline_mode = #tpu.pipeline_mode<synchronous>, transform_indices = @transform_4, window_bounds = array<i64: 1, 32>}, {pipeline_mode = #tpu.pipeline_mode<synchronous>, transform_indices = @transform_5, window_bounds = array<i64: 1, 32>}, {transform_indices = @transform_6, window_bounds = array<i64: 1, 1>}, {transform_indices = @transform_7, window_bounds = array<i64: 8, 1>}]} {
    %c0 = arith.constant 0 : index
    %c0_0 = arith.constant 0 : index
    %0 = vector.load %arg1[%c0, %c0_0] : memref<8x4xf32, #tpu.memory_space<vmem>>, vector<8x4xf32>
    %c0_1 = arith.constant 0 : index
    %c0_2 = arith.constant 0 : index
    %1 = vector.load %arg2[%c0_1, %c0_2] : memref<4x32xf32, #tpu.memory_space<vmem>>, vector<4x32xf32>
    %cst = arith.constant dense<0.000000e+00> : vector<8x32xf32>
    %2 = tpu.matmul %0, %1, %cst {dimension_numbers = #tpu.dot_dimension_numbers<[1], [0], [0], [1], [0, 0, 1, 1], [], []>} : vector<8x4xf32>, vector<4x32xf32>, vector<8x32xf32> -> vector<8x32xf32>
    %c0_3 = arith.constant 0 : index
    %c0_4 = arith.constant 0 : index
    %3 = vector.load %arg3[%c0_3, %c0_4] : memref<1x32xf32, #tpu.memory_space<vmem>>, vector<1x32xf32>
    %4 = vector.broadcast %3 : vector<1x32xf32> to vector<8x32xf32>
    %5 = arith.addf %2, %4 : vector<8x32xf32>
    %6 = math.tanh %5 : vector<8x32xf32>
    %c0_5 = arith.constant 0 : index
    %c0_6 = arith.constant 0 : index
    %7 = vector.load %arg4[%c0_5, %c0_6] : memref<32x32xf32, #tpu.memory_space<vmem>>, vector<32x32xf32>
    %cst_7 = arith.constant dense<0.000000e+00> : vector<8x32xf32>
    %8 = tpu.matmul %6, %7, %cst_7 {dimension_numbers = #tpu.dot_dimension_numbers<[1], [0], [0], [1], [0, 0, 1, 1], [], []>} : vector<8x32xf32>, vector<32x32xf32>, vector<8x32xf32> -> vector<8x32xf32>
    %c0_8 = arith.constant 0 : index
    %c0_9 = arith.constant 0 : index
    %9 = vector.load %arg5[%c0_8, %c0_9] : memref<1x32xf32, #tpu.memory_space<vmem>>, vector<1x32xf32>
    %10 = vector.broadcast %9 : vector<1x32xf32> to vector<8x32xf32>
    %11 = arith.addf %8, %10 : vector<8x32xf32>
    %12 = math.tanh %11 : vector<8x32xf32>
    %c0_10 = arith.constant 0 : index
    %c0_11 = arith.constant 0 : index
    %13 = vector.load %arg6[%c0_10, %c0_11] : memref<1x32xf32, #tpu.memory_space<vmem>>, vector<1x32xf32>
    %14 = vector.broadcast %13 : vector<1x32xf32> to vector<8x32xf32>
    %15 = arith.mulf %12, %14 : vector<8x32xf32>
    %cst_12 = arith.constant dense<0.000000e+00> : vector<8xf32>
    %16 = vector.multi_reduction <add>, %15, %cst_12 [1] : vector<8x32xf32> to vector<8xf32>
    %17 = vector.shape_cast %16 : vector<8xf32> to vector<8x1xf32>
    %c0_13 = arith.constant 0 : index
    %c0_14 = arith.constant 0 : index
    %18 = memref.load %arg7[%c0_13, %c0_14] : memref<1x1xf32, #tpu.memory_space<smem>>
    %19 = vector.broadcast %18 : f32 to vector<8x1xf32>
    %20 = arith.addf %17, %19 : vector<8x1xf32>
    %c0_15 = arith.constant 0 : index
    %c0_16 = arith.constant 0 : index
    %21 = vector.load %arg8[%c0_15, %c0_16] : memref<8x1xf32, #tpu.memory_space<vmem>>, vector<8x1xf32>
    tpu.vector_store %arg8[%c0_15, %c0_16], %20 {strides = array<i32>} : memref<8x1xf32, #tpu.memory_space<vmem>>, vector<8x1xf32>,
    return
  }
  func.func @transform_0(%arg0: i32) -> (i32, i32) {
    %c0_i32 = arith.constant 0 : i32
    %c0_i32_0 = arith.constant 0 : i32
    return %arg0, %c0_i32 : i32, i32
  }
  func.func @transform_1(%arg0: i32) -> (i32, i32) {
    %c0_i32 = arith.constant 0 : i32
    %c0_i32_0 = arith.constant 0 : i32
    %c0_i32_1 = arith.constant 0 : i32
    return %c0_i32, %c0_i32_0 : i32, i32
  }
  func.func @transform_2(%arg0: i32) -> (i32, i32) {
    %c0_i32 = arith.constant 0 : i32
    %c0_i32_0 = arith.constant 0 : i32
    %c0_i32_1 = arith.constant 0 : i32
    return %c0_i32, %c0_i32_0 : i32, i32
  }
  func.func @transform_3(%arg0: i32) -> (i32, i32) {
    %c0_i32 = arith.constant 0 : i32
    %c0_i32_0 = arith.constant 0 : i32
    %c0_i32_1 = arith.constant 0 : i32
    return %c0_i32, %c0_i32_0 : i32, i32
  }
  func.func @transform_4(%arg0: i32) -> (i32, i32) {
    %c0_i32 = arith.constant 0 : i32
    %c0_i32_0 = arith.constant 0 : i32
    %c0_i32_1 = arith.constant 0 : i32
    return %c0_i32, %c0_i32_0 : i32, i32
  }
  func.func @transform_5(%arg0: i32) -> (i32, i32) {
    %c0_i32 = arith.constant 0 : i32
    %c0_i32_0 = arith.constant 0 : i32
    %c0_i32_1 = arith.constant 0 : i32
    return %c0_i32, %c0_i32_0 : i32, i32
  }
  func.func @transform_6(%arg0: i32) -> (i32, i32) {
    %c0_i32 = arith.constant 0 : i32
    %c0_i32_0 = arith.constant 0 : i32
    %c0_i32_1 = arith.constant 0 : i32
    return %c0_i32, %c0_i32_0 : i32, i32
  }
  func.func @transform_7(%arg0: i32) -> (i32, i32) {
    %c0_i32 = arith.constant 0 : i32
    %c0_i32_0 = arith.constant 0 : i32
    return %arg0, %c0_i32 : i32, i32
  }
}

</mosaic_0001>

<bundles_post_ra>
// kernel: tpu_custom_call.1
= control target key start
LH: loop header
LB: loop body
LE: loop exit
PB: predicated region body
PF: predicated region fallthrough
CT: control target
= control target key end

     0   :  { %13 = vsyncpa [#allocation4], 0  ;;  %s296_s24 = smov [#allocation3]   ;;  %s365_s0 = inlined_call_operand.vmem [shape: f32[8,4], index: 0, kind: input, shape index: {}]   ;;  %s366_s1 = inlined_call_operand.vmem [shape: f32[4,32], index: 1, kind: input, shape index: {}]   ;;  %s367_s2 = inlined_call_operand.vmem [shape: f32[1,32], index: 2, kind: input, shape index: {}]   ;;  %s368_s3 = inlined_call_operand.hbm [shape: f32[32,32], index: 3, kind: input, shape index: {}]   ;;  %s369_s4 = inlined_call_operand.vmem [shape: f32[1,32], index: 4, kind: input, shape index: {}]   ;;  %s370_s5 = inlined_call_operand.vmem [shape: f32[1,32], index: 5, kind: input, shape index: {}]   ;;  %s371_s6 = inlined_call_operand.<no memory space> [shape: f32[1,1], index: 6, kind: input, shape index: {}]   ;;  %s372_s7 = inlined_call_operand.vmem [shape: f32[8,1], index: 7, kind: output, shape index: {}]  }
   0x1   :  { %s25_s25 = sshll.u32 %s296_s24, 4  ;;  %s26_s25 = int_to_ptr.vmem [resolvable:$true] %s25_s25 }
   0x2   :  { %s282_s26 = scalar_lea.vmem %s26_s25, 512  ;;  %p287_p1 = scmp.lt.s32.totalorder %s26_s25, %s26_s25 }
   0x3   :  { %p283_p0 = scmp.ne.s32.totalorder %s26_s25, %s282_s26  ;;  %p288_p2 = scmp.lt.s32.totalorder %s282_s26, %s282_s26 }
   0x5   :  { %p289_p3 = por %p288_p2, %p287_p1 }
   0x7   :  { %p290_p4 = pnand %p289_p3, %p283_p0 }
   0x9   :  { %293 = shalt.err (!%p290_p4)
}
   0xa   :  { %s297_s27 = smov 128   ;;  %s298_s28 = smov 8  }
   0xb   :  { %31 = dma.hbm_to_vmem [thread:$0]  %s368_s3, 512, %s26_s25, [#allocation4], %s297_s27, %s297_s27, %s298_s28  }
   0xc   :  { %294 = dma.done.wait [#allocation4], 512  }
   0xd   :  { %295 = vsyncadd [#allocation4], 4294966784  ;;  %v299_v0 = vmov 0.0   ;;  %vm300_vm0 = vmmov 0   ;;  %vm54_vm1 = vcmask 1043456   ;;  %vm50_vm2 = vcmask 31744  }
   0xe   :  { %249 = vmatprep.subr.mxu0 %v299_v0  ;;  %251 = vmatprep.mubr.msk.f32.mxu0 %vm300_vm0, %v299_v0  ;;  %v42_v1 = vld [vmem:[%s366_s1] sm:$0xf]  ;;  %v132_v3 = vld [vmem:[#allocation3 + $0x18] sm:$0xff]  ;;  %v131_v4 = vld [vmem:[#allocation3 + $0x10] sm:$0xff]  ;;  %vm140_vm3 = vcmask 261120   ;;  %v227_v20 = vstv %s371_s6  ;;  %vm229_vm4 = vcmask 7168  }
   0xf   :  { %254 = vmatprep.subr.mxu1 %v299_v0  ;;  %262 = vmatprep.mubr.msk.f32.mxu1 %vm300_vm0, %v299_v0  ;;  %v41_v2 = vld [vmem:[%s365_s0] sm:$0xff]  ;;  %v130_v5 = vld [vmem:[#allocation3 + $0x8] sm:$0xff] }
  0x10   :  { %250 = vmatpush3.msk.msra.mxu0 %vm54_vm1, %v42_v1  ;;  %255 = vmatpush3.msra.mxu1 %v132_v3  ;;  %v129_v6 = vld [vmem:[#allocation3] sm:$0xff] }
  0x11   :  { %252 = vmatmul.mubr.msk.f32.vlgmr.msra.gmra.mxu0 %vm50_vm2, %v41_v2  ;;  %256 = vmatprep.subr.mxu1 %v299_v0  ;;  %v236_v7 = vld [vmem:[%s367_s2] ss:$0 sm:$0xff] }
  0x12   :  { %257 = vmatpush3.msra.mxu1 %v131_v4  ;;  %v239_v12 = vld [vmem:[%s369_s4] ss:$0 sm:$0xff] }
  0x13   :  { %258 = vmatprep.subr.mxu1 %v299_v0  ;;  %v241_v16 = vld [vmem:[%s370_s5] ss:$0 sm:$0xff] }
  0x14   :  { %259 = vmatpush3.msra.mxu1 %v130_v5 }
  0x15   :  { %260 = vmatprep.subr.mxu1 %v299_v0 }
  0x16   :  { %261 = vmatpush3.msra.mxu1 %v129_v6 }
  0xd1   :  { %v124_v8 = vpop.f32.mrf.mxu0 }
  0xd2   :  { %v125_v9 = vadd.f32 %v236_v7, %v124_v8 }
  0xd3   :  { %v253_v10 = vpop.f32.mrf.mxu0 }
  0xd4   :  { %270 = vtanh.f32 %v125_v9 }
  0xe1   :  { %v271_v11 = vpop.eup %270 }
  0xe2   :  { %263 = vmatmul.mubr.msk.f32.vlgmr.msra.gmra.mxu1 %vm140_vm3, %v271_v11 }
 0x1a2   :  { %v210_v13 = vpop.f32.mrf.mxu1 }
 0x1a3   :  { %v211_v14 = vadd.f32 %v239_v12, %v210_v13 }
 0x1a4   :  { %v264_v15 = vpop.f32.mrf.mxu1 }
 0x1a5   :  { %272 = vtanh.f32 %v211_v14 }
 0x1b2   :  { %v273_v17 = vpop.eup %272 }
 0x1b3   :  { %v222_v18 = vmul.f32 %v273_v17, %v241_v16 }
 0x1b5   :  { %v223_v19 = vsel %vm140_vm3, %v222_v18, 0.0 }
 0x1b6   :  { %224 = vadd.xlane.f32.xlu0 %v223_v19 }
 0x23f   :  { %v225_v21 = vpop.xlane.xlu0 %224 }
 0x240   :  { %v228_v22 = vadd.f32 %v227_v20, %v225_v21 }
 0x242   :  { %230 = vst.msk [vmem:[%s372_s7] sm:$0xff] %vm229_vm4, %v228_v22 }
 0x243   :  { %235 = vsyncpa [#allocation4], 1 }

</bundles_post_ra>
